<compile_context>
chip_gen: v6e
topology: v6e:2x2x1
jax: 0.10.0
libtpu: 0.0.40
codegen_flags: <defaults>
</compile_context>

<pallas_src>
import jax
import jax.numpy as jnp
import numpy as np
from jax.experimental import pallas as pl
from jax.experimental.pallas import tpu as pltpu


def _rope_kernel(cos_ref, sina_ref, sinb_ref, q_ref, k_ref, qo_ref, ko_ref):
    """out = x*cos + roll(x,-1)*sinA + roll(x,+1)*sinB  on a (rows, lanes) tile.

    sinA = -sin on even channels < rot_dim (0 elsewhere)
    sinB = +sin on odd  channels < rot_dim (0 elsewhere)
    cos  =  cos on channels < rot_dim, 1 elsewhere (pass-through)
    so the pairwise rotate_half and the pass-through region come out of the
    tables; the circular wrap of the rolls always lands on a zero coefficient.
    """
    cos = cos_ref[...]           # (tS, LW) f32
    sa = sina_ref[...]           # (tS, LW) f32
    sb = sinb_ref[...]           # (tS, LW) f32
    lw = cos.shape[-1]           # static

    def rotate(x):
        xf = x.astype(jnp.float32)
        x_next = pltpu.roll(xf, lw - 1, axis=1)   # lane j <- x[j+1]
        x_prev = pltpu.roll(xf, 1, axis=1)        # lane j <- x[j-1]
        return xf * cos + x_next * sa + x_prev * sb

    qo_ref[...] = rotate(q_ref[...]).astype(qo_ref.dtype)
    ko_ref[...] = rotate(k_ref[...]).astype(ko_ref.dtype)


def _fold_factor(S, C):
    """Smallest r dividing S with (r*C) % 128 == 0 (lane-dense stores); else 1."""
    if C % 128 == 0:
        return 1
    for r in range(1, S + 1):
        if S % r == 0 and (r * C) % 128 == 0:
            return r
    return 1


def rotational_positional_encoding_1d(q, k, channels, theta=10000.0):
    """Pallas equivalent of RotationalPositionalEncoding1D(channels).forward(q, k)."""
    assert q.shape == k.shape
    B, S, C = q.shape
    assert C == channels
    assert C % 2 == 0, "channels must be even"
    dim = C // 2                          # RotaryEmbedding(dim=channels//2)
    assert dim % 2 == 0, "channels // 2 must be even (interleaved pairs)"

    # ---- frequency tables (S, C), f32 -------------------------------------
    inv_freq = 1.0 / (theta ** (jnp.arange(0, dim, 2, dtype=jnp.float32) / dim))
    pos = jnp.arange(S, dtype=jnp.float32)
    freqs = jnp.repeat(pos[:, None] * inv_freq[None, :], 2, axis=-1)   # (S, dim)
    cos_t = jnp.concatenate(
        [jnp.cos(freqs), jnp.ones((S, C - dim), jnp.float32)], axis=-1)    # (S, C)
    sin_t = jnp.concatenate(
        [jnp.sin(freqs), jnp.zeros((S, C - dim), jnp.float32)], axis=-1)   # (S, C)
    ch = jnp.arange(C)
    rot = ch < dim
    sina = jnp.where(rot & (ch % 2 == 0), -sin_t, 0.0)   # feeds roll(x, -1)
    sinb = jnp.where(rot & (ch % 2 == 1), sin_t, 0.0)    # feeds roll(x, +1)

    # ---- lane-dense folding: (B, S, C) -> (B, S//r, r*C) -------------------
    r = _fold_factor(S, C)
    S2, LW = S // r, r * C
    q2 = q.reshape(B, S2, LW)
    k2 = k.reshape(B, S2, LW)
    cos2 = cos_t.reshape(S2, LW)
    sina2 = sina.reshape(S2, LW)
    sinb2 = sinb.reshape(S2, LW)

    # ---- seq tiling: ~2 MiB per q/k tile, sublane multiple of 8 ------------
    itemsize = np.dtype(q.dtype).itemsize
    target_rows = max(8, (2 << 20) // max(1, LW * itemsize))
    if S2 <= target_rows:
        tS = S2                                    # full extent (always legal)
    else:
        tS = max(8, (target_rows // 8) * 8)        # multiple of 8
    nS = pl.cdiv(S2, tS)

    tbl_spec = pl.BlockSpec((tS, LW), lambda s, b: (s, 0))
    qk_spec = pl.BlockSpec((None, tS, LW), lambda s, b: (b, s, 0))

    cost = pl.CostEstimate(
        flops=10 * B * S * C,                 # 3 mul + 2 add per element, x2 tensors
        transcendentals=0,
        bytes_accessed=4 * B * S * C * itemsize + 3 * S * C * 4,
    )

    q_out, k_out = pl.pallas_call(
        _rope_kernel,
        out_shape=(jax.ShapeDtypeStruct((B, S2, LW), q.dtype),
                   jax.ShapeDtypeStruct((B, S2, LW), k.dtype)),
        grid=(nS, B),
        in_specs=[tbl_spec, tbl_spec, tbl_spec, qk_spec, qk_spec],
        out_specs=(qk_spec, qk_spec),
        compiler_params=pltpu.CompilerParams(
            dimension_semantics=("parallel", "parallel")),
        cost_estimate=cost,
    )(cos2, sina2, sinb2, q2, k2)

    return q_out.reshape(B, S, C), k_out.reshape(B, S, C)


def _ref_rotate(x, channels, theta=10000.0):
    """Pure-numpy reference matching rotary_embedding_torch.rotate_queries_or_keys."""
    x = np.asarray(x, dtype=np.float32)
    S, C = x.shape[-2], x.shape[-1]
    dim = channels // 2
    inv_freq = 1.0 / (theta ** (np.arange(0, dim, 2, dtype=np.float32) / dim))
    pos = np.arange(S, dtype=np.float32)
    freqs = np.repeat(pos[:, None] * inv_freq[None, :], 2, axis=-1)   # (S, dim)
    cos, sin = np.cos(freqs), np.sin(freqs)
    x_rot, x_pass = x[..., :dim], x[..., dim:]
    x1 = x_rot[..., 0::2]
    x2 = x_rot[..., 1::2]
    rot_half = np.stack([-x2, x1], axis=-1).reshape(x_rot.shape)
    out = x_rot * cos + rot_half * sin
    return np.concatenate([out, x_pass], axis=-1)


if __name__ == "__main__":
    B, S, C = 2, 8, 32   # channels = 32 -> rotary dim = 16, 8 frequencies
    key = jax.random.PRNGKey(0)
    kq, kk = jax.random.split(key)
    q = jax.random.normal(kq, (B, S, C), dtype=jnp.float32)
    k = jax.random.normal(kk, (B, S, C), dtype=jnp.float32)

    q_rot, k_rot = rotational_positional_encoding_1d(q, k, channels=C)
    q_rot = jax.block_until_ready(q_rot)
    k_rot = jax.block_until_ready(k_rot)

    np.testing.assert_allclose(np.asarray(q_rot), _ref_rotate(q, C), rtol=1e-5, atol=1e-5)
    np.testing.assert_allclose(np.asarray(k_rot), _ref_rotate(k, C), rtol=1e-5, atol=1e-5)
    print("KERNEL_OK")
</pallas_src>

<mosaic_0001>
module attributes {stable_mosaic.version = 11 : i64} {
  func.func @_rope_kernel(%arg0: i32, %arg1: i32, %arg2: memref<2x128xf32, #tpu.memory_space<vmem>>, %arg3: memref<2x128xf32, #tpu.memory_space<vmem>>, %arg4: memref<2x128xf32, #tpu.memory_space<vmem>>, %arg5: memref<1x2x128xf32, #tpu.memory_space<vmem>>, %arg6: memref<1x2x128xf32, #tpu.memory_space<vmem>>, %arg7: memref<1x2x128xf32, #tpu.memory_space<vmem>>, %arg8: memref<1x2x128xf32, #tpu.memory_space<vmem>>) attributes {dimension_semantics = [#tpu.dimension_semantics<parallel>, #tpu.dimension_semantics<parallel>], iteration_bounds = array<i64: 1, 2>, scalar_prefetch = 0 : i64, scratch_operands = 0 : i64, tpu.core_type = #tpu.core_type<tc>, window_params = [{transform_indices = @transform_0, window_bounds = array<i64: 2, 128>}, {transform_indices = @transform_1, window_bounds = array<i64: 2, 128>}, {transform_indices = @transform_2, window_bounds = array<i64: 2, 128>}, {transform_indices = @transform_3, window_bounds = array<i64: 1, 2, 128>}, {transform_indices = @transform_4, window_bounds = array<i64: 1, 2, 128>}, {transform_indices = @transform_5, window_bounds = array<i64: 1, 2, 128>}, {transform_indices = @transform_6, window_bounds = array<i64: 1, 2, 128>}]} {
    %c0 = arith.constant 0 : index
    %c0_0 = arith.constant 0 : index
    %0 = vector.load %arg2[%c0, %c0_0] : memref<2x128xf32, #tpu.memory_space<vmem>>, vector<2x128xf32>
    %c0_1 = arith.constant 0 : index
    %c0_2 = arith.constant 0 : index
    %1 = vector.load %arg3[%c0_1, %c0_2] : memref<2x128xf32, #tpu.memory_space<vmem>>, vector<2x128xf32>
    %c0_3 = arith.constant 0 : index
    %c0_4 = arith.constant 0 : index
    %2 = vector.load %arg4[%c0_3, %c0_4] : memref<2x128xf32, #tpu.memory_space<vmem>>, vector<2x128xf32>
    %c0_5 = arith.constant 0 : index
    %c0_6 = arith.constant 0 : index
    %c0_7 = arith.constant 0 : index
    %3 = vector.load %arg5[%c0_5, %c0_6, %c0_7] : memref<1x2x128xf32, #tpu.memory_space<vmem>>, vector<1x2x128xf32>
    %4 = vector.shape_cast %3 : vector<1x2x128xf32> to vector<2x128xf32>
    %c127_i32 = arith.constant 127 : i32
    %5 = tpu.dynamic_rotate %4 by %c127_i32 dim 1 : vector<2x128xf32>, i32 -> vector<2x128xf32>
    %c1_i32 = arith.constant 1 : i32
    %6 = tpu.dynamic_rotate %4 by %c1_i32 dim 1 : vector<2x128xf32>, i32 -> vector<2x128xf32>
    %7 = arith.mulf %4, %0 : vector<2x128xf32>
    %8 = arith.mulf %5, %1 : vector<2x128xf32>
    %9 = arith.addf %7, %8 : vector<2x128xf32>
    %10 = arith.mulf %6, %2 : vector<2x128xf32>
    %11 = arith.addf %9, %10 : vector<2x128xf32>
    %c0_8 = arith.constant 0 : index
    %c0_9 = arith.constant 0 : index
    %c0_10 = arith.constant 0 : index
    %12 = vector.load %arg7[%c0_8, %c0_9, %c0_10] : memref<1x2x128xf32, #tpu.memory_space<vmem>>, vector<1x2x128xf32>
    %13 = vector.shape_cast %12 : vector<1x2x128xf32> to vector<2x128xf32>
    %14 = vector.shape_cast %11 : vector<2x128xf32> to vector<1x2x128xf32>
    tpu.vector_store %arg7[%c0_8, %c0_9, %c0_10], %14 {strides = array<i32>} : memref<1x2x128xf32, #tpu.memory_space<vmem>>, vector<1x2x128xf32>,
    %c0_11 = arith.constant 0 : index
    %c0_12 = arith.constant 0 : index
    %c0_13 = arith.constant 0 : index
    %15 = vector.load %arg6[%c0_11, %c0_12, %c0_13] : memref<1x2x128xf32, #tpu.memory_space<vmem>>, vector<1x2x128xf32>
    %16 = vector.shape_cast %15 : vector<1x2x128xf32> to vector<2x128xf32>
    %c127_i32_14 = arith.constant 127 : i32
    %17 = tpu.dynamic_rotate %16 by %c127_i32_14 dim 1 : vector<2x128xf32>, i32 -> vector<2x128xf32>
    %c1_i32_15 = arith.constant 1 : i32
    %18 = tpu.dynamic_rotate %16 by %c1_i32_15 dim 1 : vector<2x128xf32>, i32 -> vector<2x128xf32>
    %19 = arith.mulf %16, %0 : vector<2x128xf32>
    %20 = arith.mulf %17, %1 : vector<2x128xf32>
    %21 = arith.addf %19, %20 : vector<2x128xf32>
    %22 = arith.mulf %18, %2 : vector<2x128xf32>
    %23 = arith.addf %21, %22 : vector<2x128xf32>
    %c0_16 = arith.constant 0 : index
    %c0_17 = arith.constant 0 : index
    %c0_18 = arith.constant 0 : index
    %24 = vector.load %arg8[%c0_16, %c0_17, %c0_18] : memref<1x2x128xf32, #tpu.memory_space<vmem>>, vector<1x2x128xf32>
    %25 = vector.shape_cast %24 : vector<1x2x128xf32> to vector<2x128xf32>
    %26 = vector.shape_cast %23 : vector<2x128xf32> to vector<1x2x128xf32>
    tpu.vector_store %arg8[%c0_16, %c0_17, %c0_18], %26 {strides = array<i32>} : memref<1x2x128xf32, #tpu.memory_space<vmem>>, vector<1x2x128xf32>,
    return
  }
  func.func @transform_0(%arg0: i32, %arg1: i32) -> (i32, i32) {
    %c0_i32 = arith.constant 0 : i32
    %c0_i32_0 = arith.constant 0 : i32
    return %arg0, %c0_i32 : i32, i32
  }
  func.func @transform_1(%arg0: i32, %arg1: i32) -> (i32, i32) {
    %c0_i32 = arith.constant 0 : i32
    %c0_i32_0 = arith.constant 0 : i32
    return %arg0, %c0_i32 : i32, i32
  }
  func.func @transform_2(%arg0: i32, %arg1: i32) -> (i32, i32) {
    %c0_i32 = arith.constant 0 : i32
    %c0_i32_0 = arith.constant 0 : i32
    return %arg0, %c0_i32 : i32, i32
  }
  func.func @transform_3(%arg0: i32, %arg1: i32) -> (i32, i32, i32) {
    %c0_i32 = arith.constant 0 : i32
    %c0_i32_0 = arith.constant 0 : i32
    return %arg1, %arg0, %c0_i32 : i32, i32, i32
  }
  func.func @transform_4(%arg0: i32, %arg1: i32) -> (i32, i32, i32) {
    %c0_i32 = arith.constant 0 : i32
    %c0_i32_0 = arith.constant 0 : i32
    return %arg1, %arg0, %c0_i32 : i32, i32, i32
  }
  func.func @transform_5(%arg0: i32, %arg1: i32) -> (i32, i32, i32) {
    %c0_i32 = arith.constant 0 : i32
    %c0_i32_0 = arith.constant 0 : i32
    return %arg1, %arg0, %c0_i32 : i32, i32, i32
  }
  func.func @transform_6(%arg0: i32, %arg1: i32) -> (i32, i32, i32) {
    %c0_i32 = arith.constant 0 : i32
    %c0_i32_0 = arith.constant 0 : i32
    return %arg1, %arg0, %c0_i32 : i32, i32, i32
  }
}

</mosaic_0001>

<bundles_post_ra>
// kernel: tpu_custom_call.1
= control target key start
LH: loop header
LB: loop body
LE: loop exit
PB: predicated region body
PF: predicated region fallthrough
CT: control target
= control target key end

     0   :  { %s1237_s0 = inlined_call_operand.hbm [shape: f32[2,128], index: 0, kind: input, shape index: {}]   ;;  %s1238_s1 = inlined_call_operand.hbm [shape: f32[2,128], index: 1, kind: input, shape index: {}]   ;;  %s1239_s2 = inlined_call_operand.hbm [shape: f32[2,128], index: 2, kind: input, shape index: {}]   ;;  %s1240_s3 = inlined_call_operand.vmem [shape: f32[2,2,128], index: 3, kind: input, shape index: {}]   ;;  %s1241_s4 = inlined_call_operand.hbm [shape: f32[2,2,128], index: 4, kind: input, shape index: {}]   ;;  %s1242_s5 = inlined_call_operand.hbm [shape: f32[2,2,128], index: 5, kind: output, shape index: {0}]   ;;  %s1243_s6 = inlined_call_operand.hbm [shape: f32[2,2,128], index: 6, kind: output, shape index: {1}]  }
   0x1   :  { %1248 = sst [smem:[#allocation18_spill]] %s1237_s0 }
   0x2   :  { %1249 = sst [smem:[#allocation19_spill]] %s1238_s1 }
   0x3   :  { %12 = vsyncpa [#allocation3], 0 }
   0x4   :  { %13 = vsyncpa [#allocation6], 0 }
   0x5   :  { %14 = vsyncpa [#allocation9], 0 }
   0x6   :  { %16 = vsyncpa [#allocation9 + $0x1], 0 }
   0x7   :  { %17 = vsyncpa [#allocation4], 0 }
   0x8   :  { %19 = vsyncpa [#allocation4 + $0x1], 0 }
   0x9   :  { %20 = vsyncpa [#allocation12], 0 }
   0xa   :  { %22 = vsyncpa [#allocation12 + $0x1], 0  ;;  %s1000_s21 = smov 0   ;;  %s1002_s22 = smov 0  }
   0xb   :  { %s1004_s23 = smov 0   ;;  %s1006_s24 = smov 0  }
   0xc   :  { %s1008_s25 = smov 0   ;;  %s1010_s26 = smov 0  }
   0xd LB: > { %s608_s27 = sadd.s32 4294967295, %s955_s26   ;;  %s609_s28 = sadd.s32 4294967294, %s955_s26   ;;  %s955_s26 = sphi %s1010_s26, %s28_s26   ;;  %s951_s25 = sphi %s1008_s25, %s1270_s25   ;;  %s947_s24 = sphi %s1006_s24, %s1269_s24   ;;  %s943_s23 = sphi %s1004_s23, %s1268_s23   ;;  %s939_s22 = sphi %s1002_s22, %s1267_s22   ;;  %s935_s21 = sphi %s1000_s21, %s1266_s21  }
   0xe   : > { %p168_p0 = scmp.ne.s32.totalorder %s939_s22, %s935_s21  ;;  %p1034_p1 = scmp.eq.s32.totalorder %s608_s27, 0 }
   0xf   : > { %p1038_p2 = scmp.eq.s32.totalorder %s608_s27, 1  ;;  %p200_p3 = scmp.eq.s32.totalorder %s609_s28, 1 }
  0x10   : > { %s1250_s29 = scalar_select %p1034_p1, 1, 0 }
  0x11   : > { %s1251_s30 = scalar_select %p1038_p2, 1, 0 }
  0x12   : > { %p1044_p4 = por %p1034_p1, %p168_p0  ;;  %p610_p5 = scmp.ge.s32.totalorder %s955_s26, 1 }
  0x13   : > { %p1049_p6 = por %p200_p3, %p168_p0  ;;  %p235_p7 = scmp.lt.s32.totalorder %s955_s26, 3 }
  0x14   : > { %s1252_s7 = scalar_select %p1044_p4, 1, 0 }
  0x15   : > { %s1253_s8 = scalar_select %p1049_p6, 1, 0 }
  0x16   : > { %p1054_p8 = pnand %p610_p5, %p235_p7  ;;  %s957_s10 = smov [#allocation5]  }
  0x17   : > { %s263_s11 = sshll.u32 %s957_s10, 4  ;;  %s958_s13 = smov [#allocation2]   ;;  %s264_s11 = int_to_ptr.vmem [resolvable:$true] %s263_s11 }
  0x18   : > { %s1254_s9 = scalar_select %p1054_p8, 1, 0 }
  0x19   : > { %p649_p10 = pneg %p1054_p8  ;;  %s250_s14 = sshll.u32 %s958_s13, 4  ;;  %s251_s14 = int_to_ptr.vmem [resolvable:$true] %s250_s14 }
  0x1a   : > { %s959_s15 = smov [#allocation7]   ;;  %s742_s17 = scalar_lea.vmem %s264_s11, 32 }
  0x1b   : > { %p1063_p11 = pnand %p649_p10, %p1034_p1  ;;  %s276_s16 = sshll.u32 %s959_s15, 4  ;;  %s277_s16 = int_to_ptr.vmem [resolvable:$true] %s276_s16 }
  0x1c   : > { %p743_p13 = scmp.ne.s32.totalorder %s264_s11, %s742_s17  ;;  %p750_p5 = scmp.lt.s32.totalorder %s264_s11, %s264_s11 }
  0x1d   : > { %p733_p12 = pneg %p1063_p11  ;;  %p751_p7 = scmp.lt.s32.totalorder %s742_s17, %s742_s17 }
  0x1f   : > { %p745_p0 = pnand %p743_p13, %p733_p12  ;;  %p752_p10 = por %p751_p7, %p750_p5 }
  0x21   : > { %p746_p3 = pneg %p745_p0 }
  0x23   : > { %p753_p9 = pnand %p752_p10, %p746_p3 }
  0x25   : > { %756 = shalt.err (!%p753_p9)
}
  0x26   : > { %s1256_s1 = sld [smem:[#allocation19_spill]]  ;;  %s768_s20 = scalar_lea.vmem %s251_s14, 32 }
  0x27   : > { %p769_p6 = scmp.ne.s32.totalorder %s251_s14, %s768_s20  ;;  %p776_p13 = scmp.lt.s32.totalorder %s251_s14, %s251_s14 }
  0x28   : > { %p777_p0 = scmp.lt.s32.totalorder %s768_s20, %s768_s20 }
  0x29   : > { %p771_p4 = pnand %p769_p6, %p733_p12 }
  0x2a   : > { %p778_p8 = por %p777_p0, %p776_p13 }
  0x2b   : > { %p772_p1 = pneg %p771_p4 }
  0x2c   : > { %655 = dma.hbm_to_vmem [thread:$0]  (!%p1063_p11), %s1256_s1, 32, %s264_s11, [#allocation6]  }
  0x2d   : > { %p779_p2 = pnand %p778_p8, %p772_p1 }
  0x2f   : > { %782 = shalt.err (!%p779_p2)
}
  0x30   : > { %s1257_s0 = sld [smem:[#allocation18_spill]]  ;;  %s794_s10 = scalar_lea.vmem %s277_s16, 32 }
  0x31   : > { %p795_p9 = scmp.ne.s32.totalorder %s277_s16, %s794_s10  ;;  %p802_p4 = scmp.lt.s32.totalorder %s277_s16, %s277_s16 }
  0x32   : > { %p803_p5 = scmp.lt.s32.totalorder %s794_s10, %s794_s10 }
  0x33   : > { %p797_p3 = pnand %p795_p9, %p733_p12 }
  0x34   : > { %p804_p7 = por %p803_p5, %p802_p4 }
  0x35   : > { %p798_p6 = pneg %p797_p3 }
  0x36   : > { %652 = dma.hbm_to_vmem [thread:$0]  (!%p1063_p11), %s1257_s0, 32, %s251_s14, [#allocation3]  }
  0x37   : > { %p805_p10 = pnand %p804_p7, %p798_p6 }
  0x39   : > { %808 = shalt.err (!%p805_p10)
}
  0x3a   : > { %658 = dma.hbm_to_vmem [thread:$0]  (!%p1063_p11), %s1239_s2, 32, %s277_s16, [#allocation6]  }
  0x3b   : > { %s155_s14 = sadd.s32 1, %s943_s23  ;;  %s37_s15 = sadd.s32 1, %s951_s25 }
  0x3c   : > { %p162_p1 = scmp.ne.s32.totalorder %s943_s23, %s939_s22  ;;  %p38_p2 = scmp.ge.s32.totalorder %s37_s15, 2 }
  0x3d   : > { %p163_p8 = scmp.eq.s32.totalorder %s955_s26, 0  ;;  %p1258_p12 = scmp.ne.s32.totalorder %s1251_s30, 0 }
  0x3e   : > { %p673_p0 = scmp.lt.s32.totalorder %s955_s26, 2  ;;  %s1272_s15 = smov (%p38_p2, %s37_s15), 0 }
  0x3f   : > { %p1100_p13 = por %p1258_p12, %p162_p1  ;;  %p164_p9 = por %p163_p8, %p162_p1 }
  0x40   : > { %s297_s17 = sand.u32 1, %s943_s23   ;;  %s150_s18 = ssub.s32 %s951_s25, %s1272_s15 }
  0x41   : > { %p153_p3 = scmp.eq.s32.totalorder %s150_s18, 0  ;;  %s615_s16 = sshll.u32 %s297_s17, 1 }
  0x42   : > { %s616_s19 = sshll.u32 %s951_s25, 5  ;;  %s301_s10 = scalar_lea.vmem [#allocation8], %s615_s16 }
  0x43   : > { %s1112_s20 = scalar_select %p153_p3, %s943_s23, %s155_s14  }
  0x44   : > { %s307_s30 = scalar_lea.hbm %s1241_s4, %s616_s19  ;;  %s309_s11 = sshll.u32 %s301_s10, 4  ;;  %s310_s11 = int_to_ptr.vmem [resolvable:$true] %s309_s11 }
  0x45   : > { %p1119_p11 = pnand %p673_p0, %p164_p9  ;;  %s298_s0 = scalar_lea.sflag [#allocation9], %s297_s17 }
  0x46   : > { %s822_s18 = scalar_lea.vmem %s310_s11, 32  ;;  %s960_s14 = smov [#allocation8]  }
  0x47   : > { %p811_p6 = pneg %p1119_p11  ;;  %p823_p4 = scmp.ne.s32.totalorder %s310_s11, %s822_s18 }
  0x48   : > { %s827_s1 = sshll.u32 %s960_s14, 4  ;;  %s828_s1 = int_to_ptr.vmem [resolvable:$false] %s827_s1 }
  0x49   : > { %p825_p5 = pnand %p823_p4, %p811_p6  ;;  %s829_s19 = scalar_lea.vmem %s828_s1, 64 }
  0x4a   : > { %p830_p10 = scmp.lt.s32.totalorder %s310_s11, %s828_s1  ;;  %p831_p1 = scmp.lt.s32.totalorder %s829_s19, %s822_s18 }
  0x4b   : > { %p826_p7 = pneg %p825_p5 }
  0x4c   : > { %p832_p2 = por %p831_p1, %p830_p10 }
  0x4e   : > { %p833_p8 = pnand %p832_p2, %p826_p7 }
  0x50   : > { %836 = shalt.err (!%p833_p8)
}
  0x51   : > { %662 = dma.hbm_to_vmem [thread:$0]  (!%p1119_p11), %s307_s30, 32, %s310_s11, %s298_s0  }
  0x52   : > { %p1261_p12 = scmp.ne.s32.totalorder %s1254_s9, 0 }
  0x53   : > { %p1262_p0 = scmp.ne.s32.totalorder (!%p1261_p12), %s1250_s29, 0 }
  0x54   : > { %318 = sbr.rel (%p1261_p12) target bundleno = 259 (0x103), region = 40 }
  0x59   : > { %914 = dma.done.wait (%p1262_p0), [#allocation3], 32  }
  0x5a   : > { %916 = vsyncadd (%p1262_p0), [#allocation3], 4294967264 }
  0x5b   : > { %918 = dma.done.wait (%p1262_p0), [#allocation6], 64  }
  0x5c   : > { %920 = vsyncadd (%p1262_p0), [#allocation6], 4294967232  ;;  %s1138_s1 = sand.u32 1, %s939_s22   ;;  %p1263_p9 = scmp.ne.s32.totalorder %s1252_s7, 0 }
  0x5d   : > { %s1141_s0 = sshll.u32 %s1138_s1, 1  ;;  %s333_s9 = scalar_lea.sflag [#allocation9], %s1138_s1 }
  0x5e   : > { %s336_s17 = scalar_lea.vmem [#allocation8], %s1141_s0 }
  0x5f   : > { %922 = dma.done.wait (%p1263_p9), %s333_s9, 32  }
  0x60   : > { %924 = vsyncadd (%p1263_p9), %s333_s9, 4294967264  ;;  %p377_p3 = scmp.lt.s32.totalorder %s947_s24, 1  ;;  %s961_s10 = smov 127   ;;  %v398_v1 = vld [vmem:[%s336_s17] sm:$0x3] }
  0x61   : > { %s962_s11 = smov 1   ;;  %v384_v2 = vld [vmem:[#allocation2] sm:$0x3]  ;;  %v385_v3 = vld [vmem:[#allocation5] sm:$0x3]  ;;  %s627_s7 = sshll.u32 %s947_s24, 5 }
  0x62   : > { %s378_s29 = scalar_select %p377_p3, %s947_s24, 1  ;;  %v386_v4 = vld [vmem:[#allocation7] sm:$0x3]  ;;  %v403_v10 = vmul.f32 %v398_v1, %v384_v2 }
  0x63   : > { %s369_s13 = scalar_lea.vmem [#allocation10], %s1141_s0  ;;  %s1159_s9 = scalar_lea.hbm %s1242_s5, %s627_s7 }
  0x64   : > { %s624_s16 = sshll.u32 %s378_s29, 1  ;;  %s429_s18 = sshll.u32 %s369_s13, 4  ;;  %s1161_s18 = int_to_ptr.vmem [resolvable:$true] %s429_s18 }
  0x65   : > { %s383_s30 = scalar_lea.vmem %s1240_s3, %s624_s16  ;;  %s376_s24 = scalar_lea.vmem [#allocation11], %s1141_s0 }
  0x66   : > { %v387_v0 = vld [vmem:[%s383_s30] sm:$0x3]  ;;  %s1166_s17 = sshll.u32 %s376_s24, 4  ;;  %s1171_s27 = scalar_lea.hbm %s1243_s6, %s627_s7  ;;  %s444_s17 = int_to_ptr.vmem [resolvable:$true] %s1166_s17 }
  0x67   : > { %388 = vrot.lane.b32.xlu0 %v387_v0, %s961_s10  ;;  %390 = vrot.lane.b32.xlu1 %v387_v0, %s962_s11  ;;  %v392_v5 = vmul.f32 %v387_v0, %v384_v2  ;;  %s410_s28 = scalar_lea.sflag [#allocation4], %s1138_s1  ;;  %s837_s30 = scalar_lea.vmem %s1161_s18, 32 }
  0x68   : > { %p838_p11 = scmp.ne.s32.totalorder %s1161_s18, %s837_s30 }
  0x6a   : > { %p839_p6 = pnand %p838_p11, %p1100_p13 }
  0x6b   : > { %399 = vrot.lane.b32.xlu0 %v398_v1, %s961_s10  ;;  %401 = vrot.lane.b32.xlu1 %v398_v1, %s962_s11  ;;  %s963_s10 = smov [#allocation10]  }
  0x6c   : > { %p840_p4 = pneg %p839_p6  ;;  %s841_s11 = sshll.u32 %s963_s10, 4  ;;  %s842_s11 = int_to_ptr.vmem [resolvable:$false] %s841_s11 }
  0x6d   : > { %s843_s14 = scalar_lea.vmem %s842_s11, 64  ;;  %p844_p5 = scmp.lt.s32.totalorder %s1161_s18, %s842_s11 }
  0x6e   : > { %p845_p7 = scmp.lt.s32.totalorder %s843_s14, %s837_s30 }
  0x70   : > { %p846_p10 = por %p845_p7, %p844_p5 }
  0x72   : > { %p847_p1 = pnand %p846_p10, %p840_p4 }
  0xd9   : > { %v389_v6 = vpop.permute.xlu0 %388  ;;  %v391_v7 = vpop.permute.xlu1 %390 }
  0xda   : > { %v393_v8 = vmul.f32 %v389_v6, %v385_v3  ;;  %v395_v9 = vmul.f32 %v391_v7, %v386_v4 }
  0xdc   : > { %v394_v11 = vadd.f32 %v393_v8, %v392_v5 }
  0xdd   : > { %v400_v12 = vpop.permute.xlu0 %399  ;;  %v402_v13 = vpop.permute.xlu1 %401 }
  0xde   : > { %v396_v14 = vadd.f32 %v395_v9, %v394_v11  ;;  %v404_v15 = vmul.f32 %v400_v12, %v385_v3  ;;  %v406_v16 = vmul.f32 %v402_v13, %v386_v4 }
  0xe0   : > { %v405_v17 = vadd.f32 %v404_v15, %v403_v10  ;;  %397 = vst [vmem:[%s369_s13] sm:$0x3] %v396_v14 }
  0xe1   : > { %850 = shalt.err (!%p847_p1)
}
  0xe2   : > { %s851_s7 = scalar_lea.hbm %s1159_s9, 32  ;;  %s855_s29 = scalar_lea.hbm %s1242_s5, 64 }
  0xe3   : > { %p852_p2 = scmp.ne.s32.totalorder %s1159_s9, %s851_s7  ;;  %p856_p0 = scmp.lt.s32.totalorder %s1159_s9, %s1242_s5 }
  0xe4   : > { %p857_p9 = scmp.lt.s32.totalorder %s855_s29, %s851_s7 }
  0xe5   : > { %p853_p8 = pnand %p852_p2, %p1100_p13 }
  0xe6   : > { %p858_p3 = por %p857_p9, %p856_p0 }
  0xe7   : > { %p854_p12 = pneg %p853_p8 }
  0xe9   : > { %p859_p11 = pnand %p858_p3, %p854_p12 }
  0xeb   : > { %862 = shalt.err (!%p859_p11)
}
  0xec   : > { %645 = dma.vmem_to_hbm [thread:$0]  (%p1100_p13), %s1161_s18, 32, %s1159_s9, %s410_s28   ;;  %v407_v18 = vadd.f32 %v406_v16, %v405_v17 }
  0xed   : > { %s415_s30 = scalar_lea.sflag [#allocation12], %s1138_s1  ;;  %s863_s11 = scalar_lea.vmem %s444_s17, 32 }
  0xee   : > { %408 = vst [vmem:[%s376_s24] sm:$0x3] %v407_v18  ;;  %p864_p6 = scmp.ne.s32.totalorder %s444_s17, %s863_s11  ;;  %s964_s14 = smov [#allocation11]  }
  0xef   : > { %s867_s7 = sshll.u32 %s964_s14, 4  ;;  %s868_s7 = int_to_ptr.vmem [resolvable:$false] %s867_s7 }
  0xf0   : > { %p865_p4 = pnand %p864_p6, %p1100_p13  ;;  %s869_s13 = scalar_lea.vmem %s868_s7, 64 }
  0xf1   : > { %p870_p7 = scmp.lt.s32.totalorder %s444_s17, %s868_s7  ;;  %p871_p10 = scmp.lt.s32.totalorder %s869_s13, %s863_s11 }
  0xf2   : > { %p866_p5 = pneg %p865_p4 }
  0xf3   : > { %p872_p1 = por %p871_p10, %p870_p7 }
  0xf5   : > { %p873_p2 = pnand %p872_p1, %p866_p5 }
  0xf7   : > { %876 = shalt.err (!%p873_p2)
}
  0xf8   : > { %s877_s0 = scalar_lea.hbm %s1171_s27, 32  ;;  %s881_s9 = scalar_lea.hbm %s1243_s6, 64 }
  0xf9   : > { %p878_p8 = scmp.ne.s32.totalorder %s1171_s27, %s877_s0  ;;  %p882_p9 = scmp.lt.s32.totalorder %s1171_s27, %s1243_s6 }
  0xfa   : > { %p883_p3 = scmp.lt.s32.totalorder %s881_s9, %s877_s0 }
  0xfb   : > { %p879_p12 = pnand %p878_p8, %p1100_p13 }
  0xfc   : > { %p884_p11 = por %p883_p3, %p882_p9 }
  0xfd   : > { %p880_p0 = pneg %p879_p12 }
  0xff   : > { %p885_p6 = pnand %p884_p11, %p880_p0 }
 0x101   : > { %888 = shalt.err (!%p885_p6)
}
 0x102   : > { %646 = dma.vmem_to_hbm [thread:$0]  (%p1100_p13), %s444_s17, 32, %s1171_s27, %s415_s30  }
 0x103 PF: > { %s455_s19 = sand.u32 1, %s935_s21   ;;  %p1264_p4 = scmp.ne.s32.totalorder %s1253_s8, 0 }
 0x104   : > { %p1265_p5 = scmp.ge.s32.totalorder %s955_s26, 2  ;;  %s456_s29 = scalar_lea.sflag [#allocation4], %s455_s19 }
 0x106   : > { %p664_p7 = pnand %p1265_p5, %p1264_p4 }
 0x108   : > { %p665_p10 = pneg %p664_p7 }
 0x10a   : > { %926 = dma.done.wait (%p665_p10), %s456_s29, 32  }
 0x10b   : > { %928 = vsyncadd (%p665_p10), %s456_s29, 4294967264  ;;  %s465_s16 = scalar_lea.sflag [#allocation12], %s455_s19 }
 0x10c   : > { %930 = dma.done.wait (%p665_p10), %s465_s16, 32  }
 0x10d   : > { %932 = vsyncadd (%p665_p10), %s465_s16, 4294967264  ;;  %s28_s26 = sadd.s32 1, %s955_s26   ;;  %s1266_s21 = smov %s939_s22 }
 0x10e   : > { %p25_p1 = scmp.ge.s32.totalorder %s28_s26, 4   ;;  %s1267_s22 = smov %s943_s23 }
 0x10f   : > { %s1268_s23 = smov %s1112_s20  ;;  %s1269_s24 = smov %s951_s25 }
 0x110   : > { %s1270_s25 = smov %s1272_s15  ;;  %27 = sbr.rel (!%p25_p1) target bundleno = 13 (0xd), region = 121 }
 0x115   :  { %470 = vsyncpa [#allocation3], 1 }
 0x116   :  { %472 = vsyncpa [#allocation3 + $0x1], 1 }
 0x117   :  { %473 = vsyncpa [#allocation6], 1 }
 0x118   :  { %474 = vsyncpa [#allocation9], 1 }
 0x119   :  { %476 = vsyncpa [#allocation9 + $0x1], 1 }
 0x11a   :  { %477 = vsyncpa [#allocation4], 1 }
 0x11b   :  { %479 = vsyncpa [#allocation4 + $0x1], 1 }
 0x11c   :  { %480 = vsyncpa [#allocation12], 1 }
 0x11d   :  { %482 = vsyncpa [#allocation12 + $0x1], 1 }

</bundles_post_ra>
